<compile_context>
chip_gen: v7x
topology: tpu7x:2x2x1
jax: 0.10.0
libtpu: 0.0.40
codegen_flags: <defaults>
</compile_context>

<pallas_src>
import jax
import jax.numpy as jnp
from jax.experimental import pallas as pl
from jax.experimental.pallas import tpu as pltpu


def _regression_kernel(seed_ref, x_ref, w1_ref, b1_ref, w2t_ref, b2_ref, o_ref):
    TB = x_ref.shape[0]          # batch-tile rows
    H = w1_ref.shape[1]          # hidden = 128

    # ---- Layer 1: x @ W1 + b1 (MXU, f32 accumulate), ReLU (VPU) ----------------
    h = jnp.dot(x_ref[...], w1_ref[...], preferred_element_type=jnp.float32)
    h = jnp.maximum(h + b1_ref[...], 0.0)                       # (TB, H)

    # ---- Dropout p=0.5 (training mode): counter-hash Bernoulli(0.5) mask -------
    # Unique 32-bit id per (global row, hidden unit), mixed with the seed through a
    # splitmix32-style avalanche; keep iff the low bit is 0, scale survivors by 2.
    row0 = pl.program_id(0) * TB
    r = jax.lax.broadcasted_iota(jnp.int32, (TB, H), 0) + row0
    c = jax.lax.broadcasted_iota(jnp.int32, (TB, H), 1)
    seed_u32 = seed_ref[0].astype(jnp.uint32)
    z = (r * H + c).astype(jnp.uint32) + seed_u32 * jnp.uint32(0x9E3779B9)
    z = z ^ (z >> 16)
    z = z * jnp.uint32(0x7FEB352D)
    z = z ^ (z >> 15)
    z = z * jnp.uint32(0x846CA68B)
    z = z ^ (z >> 16)
    keep = (z & jnp.uint32(1)) == jnp.uint32(0)
    h = jnp.where(keep, h * 2.0, 0.0)

    # ---- Layer 2: contract the hidden dim, produce a lane-dense (1, TB) row ----
    # out_row[0, b] = sum_k w2t[0, k] * h[b, k]
    out_row = jax.lax.dot_general(
        w2t_ref[...], h,
        dimension_numbers=(((1,), (1,)), ((), ())),
        preferred_element_type=jnp.float32)                     # (1, TB)
    o_ref[...] = (out_row + b2_ref[0]).astype(o_ref.dtype)


def _pick_batch_tile(B, F, max_tb=512):
    """Batch-tile rows: multiple of 8, large enough to amortize per-step overhead,
    small enough that the double-buffered x tiles stay well inside the default
    scoped-VMEM limit on every TPU generation (v7x has only 64 MiB VMEM)."""
    budget_bytes = 8 * 1024 * 1024                 # for the two x buffers
    tb = budget_bytes // (2 * max(F, 128) * 4)
    tb = max(8, min(max_tb, tb))
    b_pad8 = ((B + 7) // 8) * 8
    tb = min(tb, b_pad8)
    return max(8, (tb // 8) * 8)


def pytorch_regression_forward(x, w1, b1, w2, b2, seed, tb=None):
    """x: (B, F) f32; w1: (F, 128); b1: (128,); w2: (128, 1); b2: (1,)."""
    B, F = x.shape
    H = w1.shape[1]

    if tb is None:
        tb = _pick_batch_tile(B, F)
    num_tiles = (B + tb - 1) // tb
    b_pad = num_tiles * tb
    if b_pad != B:
        x = jnp.pad(x, ((0, b_pad - B), (0, 0)))   # padded rows are sliced away below

    b1_2d = b1.reshape(1, H)
    w2t = w2.reshape(H, 1).T                       # (1, H)
    b2_1d = b2.reshape(1).astype(jnp.float32)
    seed_arr = jnp.asarray([seed], dtype=jnp.int32)

    grid_spec = pltpu.PrefetchScalarGridSpec(
        num_scalar_prefetch=1,                     # seed lands in SMEM
        grid=(num_tiles,),
        in_specs=[
            pl.BlockSpec((tb, F), lambda i, seed: (i, 0)),       # x: streamed per tile
            pl.BlockSpec((F, H), lambda i, seed: (0, 0)),        # W1: VMEM-resident
            pl.BlockSpec((1, H), lambda i, seed: (0, 0)),        # b1: VMEM-resident
            pl.BlockSpec((1, H), lambda i, seed: (0, 0)),        # W2^T: VMEM-resident
            pl.BlockSpec(memory_space=pltpu.MemorySpace.SMEM),   # b2 scalar in SMEM
        ],
        out_specs=pl.BlockSpec((1, tb), lambda i, seed: (i, 0)),  # lane-dense row per tile
    )

    out_rows = pl.pallas_call(
        _regression_kernel,
        out_shape=jax.ShapeDtypeStruct((num_tiles, tb), jnp.float32),
        grid_spec=grid_spec,
        compiler_params=pltpu.CompilerParams(
            dimension_semantics=("parallel",)),    # batch tiles are independent (v7x: 2 TCs)
    )(seed_arr, x, w1, b1_2d, w2t, b2_1d)

    # (num_tiles, tb) -> (B, 1), dropping any batch padding.
    return out_rows.reshape(-1)[:B].reshape(B, 1)


def init_params(key, num_features, hidden=128):
    """Deterministic init mimicking PyTorch nn.Linear default U[-1/sqrt(fan_in), 1/sqrt(fan_in)]."""
    k1, k2, k3, k4 = jax.random.split(key, 4)
    bound1 = 1.0 / jnp.sqrt(num_features)
    w1 = jax.random.uniform(k1, (num_features, hidden), jnp.float32, -bound1, bound1)
    b1 = jax.random.uniform(k2, (hidden,), jnp.float32, -bound1, bound1)
    bound2 = 1.0 / jnp.sqrt(hidden)
    w2 = jax.random.uniform(k3, (hidden, 1), jnp.float32, -bound2, bound2)
    b2 = jax.random.uniform(k4, (1,), jnp.float32, -bound2, bound2)
    return w1, b1, w2, b2


if __name__ == "__main__":
    key = jax.random.PRNGKey(0)
    k_x, k_p = jax.random.split(key)

    batch = 8
    num_features = 32

    x = jax.random.normal(k_x, (batch, num_features), jnp.float32)
    w1, b1, w2, b2 = init_params(k_p, num_features)

    out = pytorch_regression_forward(x, w1, b1, w2, b2, seed=1234)
    out = jax.block_until_ready(out)

    assert out.shape == (batch, 1)
    assert out.dtype == jnp.float32
    assert bool(jnp.all(jnp.isfinite(out)))
    print("KERNEL_OK")
</pallas_src>

<mosaic_0001>
module attributes {stable_mosaic.version = 11 : i64} {
  func.func @_regression_kernel(%arg0: i32, %arg1: memref<1xi32, #tpu.memory_space<smem>>, %arg2: memref<8x32xf32, #tpu.memory_space<vmem>>, %arg3: memref<32x128xf32, #tpu.memory_space<vmem>>, %arg4: memref<1x128xf32, #tpu.memory_space<vmem>>, %arg5: memref<1x128xf32, #tpu.memory_space<vmem>>, %arg6: memref<1xf32, #tpu.memory_space<smem>>, %arg7: memref<1x8xf32, #tpu.memory_space<vmem>>) attributes {dimension_semantics = [#tpu.dimension_semantics<parallel>], iteration_bounds = array<i64: 1>, scalar_prefetch = 1 : i64, scratch_operands = 0 : i64, tpu.core_type = #tpu.core_type<tc>, window_params = [{transform_indices = @transform_0, window_bounds = array<i64: 8, 32>}, {pipeline_mode = #tpu.pipeline_mode<synchronous>, transform_indices = @transform_1, window_bounds = array<i64: 32, 128>}, {pipeline_mode = #tpu.pipeline_mode<synchronous>, transform_indices = @transform_2, window_bounds = array<i64: 1, 128>}, {pipeline_mode = #tpu.pipeline_mode<synchronous>, transform_indices = @transform_3, window_bounds = array<i64: 1, 128>}, {transform_indices = @transform_4, window_bounds = array<i64: 1>}, {transform_indices = @transform_5, window_bounds = array<i64: 1, 8>}]} {
    %c0 = arith.constant 0 : index
    %c0_0 = arith.constant 0 : index
    %0 = vector.load %arg2[%c0, %c0_0] : memref<8x32xf32, #tpu.memory_space<vmem>>, vector<8x32xf32>
    %c0_1 = arith.constant 0 : index
    %c0_2 = arith.constant 0 : index
    %1 = vector.load %arg3[%c0_1, %c0_2] : memref<32x128xf32, #tpu.memory_space<vmem>>, vector<32x128xf32>
    %cst = arith.constant dense<0.000000e+00> : vector<8x128xf32>
    %2 = tpu.matmul %0, %1, %cst {dimension_numbers = #tpu.dot_dimension_numbers<[1], [0], [0], [1], [0, 0, 1, 1], [], []>} : vector<8x32xf32>, vector<32x128xf32>, vector<8x128xf32> -> vector<8x128xf32>
    %c0_3 = arith.constant 0 : index
    %c0_4 = arith.constant 0 : index
    %3 = vector.load %arg4[%c0_3, %c0_4] : memref<1x128xf32, #tpu.memory_space<vmem>>, vector<1x128xf32>
    %4 = vector.broadcast %3 : vector<1x128xf32> to vector<8x128xf32>
    %5 = arith.addf %2, %4 : vector<8x128xf32>
    %cst_5 = arith.constant 0.000000e+00 : f32
    %6 = vector.broadcast %cst_5 : f32 to vector<8x128xf32>
    %7 = arith.maximumf %5, %6 : vector<8x128xf32>
    %c8_i32 = arith.constant 8 : i32
    %8 = arith.muli %arg0, %c8_i32 : i32
    %9 = tpu.iota {dimensions = array<i32: 0>} : vector<8x128xi32>
    %10 = vector.broadcast %8 : i32 to vector<8x128xi32>
    %11 = arith.addi %9, %10 : vector<8x128xi32>
    %12 = tpu.iota {dimensions = array<i32: 1>} : vector<8x128xi32>
    %c0_6 = arith.constant 0 : index
    %13 = memref.load %arg1[%c0_6] : memref<1xi32, #tpu.memory_space<smem>>
    %c128_i32 = arith.constant 128 : i32
    %14 = vector.broadcast %c128_i32 : i32 to vector<8x128xi32>
    %15 = arith.muli %11, %14 : vector<8x128xi32>
    %16 = arith.addi %15, %12 : vector<8x128xi32>
    %c-1640531527_i32 = arith.constant -1640531527 : i32
    %17 = arith.muli %13, %c-1640531527_i32 : i32
    %18 = vector.broadcast %17 : i32 to vector<8x128xi32>
    %19 = arith.addi %16, %18 : vector<8x128xi32>
    %c16_i32 = arith.constant 16 : i32
    %20 = vector.broadcast %c16_i32 : i32 to vector<8x128xi32>
    %21 = arith.shrui %19, %20 : vector<8x128xi32>
    %22 = arith.xori %19, %21 : vector<8x128xi32>
    %c2146121005_i32 = arith.constant 2146121005 : i32
    %23 = vector.broadcast %c2146121005_i32 : i32 to vector<8x128xi32>
    %24 = arith.muli %22, %23 : vector<8x128xi32>
    %c15_i32 = arith.constant 15 : i32
    %25 = vector.broadcast %c15_i32 : i32 to vector<8x128xi32>
    %26 = arith.shrui %24, %25 : vector<8x128xi32>
    %27 = arith.xori %24, %26 : vector<8x128xi32>
    %c-2073254261_i32 = arith.constant -2073254261 : i32
    %28 = vector.broadcast %c-2073254261_i32 : i32 to vector<8x128xi32>
    %29 = arith.muli %27, %28 : vector<8x128xi32>
    %c16_i32_7 = arith.constant 16 : i32
    %30 = vector.broadcast %c16_i32_7 : i32 to vector<8x128xi32>
    %31 = arith.shrui %29, %30 : vector<8x128xi32>
    %32 = arith.xori %29, %31 : vector<8x128xi32>
    %c1_i32 = arith.constant 1 : i32
    %33 = vector.broadcast %c1_i32 : i32 to vector<8x128xi32>
    %34 = arith.andi %32, %33 : vector<8x128xi32>
    %c0_i32 = arith.constant 0 : i32
    %35 = vector.broadcast %c0_i32 : i32 to vector<8x128xi32>
    %36 = arith.cmpi eq, %34, %35 : vector<8x128xi32>
    %cst_8 = arith.constant 2.000000e+00 : f32
    %37 = vector.broadcast %cst_8 : f32 to vector<8x128xf32>
    %38 = arith.mulf %7, %37 : vector<8x128xf32>
    %cst_9 = arith.constant 0.000000e+00 : f32
    %39 = vector.broadcast %cst_9 : f32 to vector<8x128xf32>
    %40 = arith.select %36, %38, %39 : vector<8x128xi1>, vector<8x128xf32>
    %c0_10 = arith.constant 0 : index
    %c0_11 = arith.constant 0 : index
    %41 = vector.load %arg5[%c0_10, %c0_11] : memref<1x128xf32, #tpu.memory_space<vmem>>, vector<1x128xf32>
    %cst_12 = arith.constant dense<0.000000e+00> : vector<1x8xf32>
    %42 = tpu.matmul %41, %40, %cst_12 {dimension_numbers = #tpu.dot_dimension_numbers<[1], [1], [0], [0], [0, 0, 1, 0], [], []>} : vector<1x128xf32>, vector<8x128xf32>, vector<1x8xf32> -> vector<1x8xf32>
    %c0_13 = arith.constant 0 : index
    %43 = memref.load %arg6[%c0_13] : memref<1xf32, #tpu.memory_space<smem>>
    %44 = vector.broadcast %43 : f32 to vector<1x8xf32>
    %45 = arith.addf %42, %44 : vector<1x8xf32>
    %c0_14 = arith.constant 0 : index
    %c0_15 = arith.constant 0 : index
    %46 = vector.load %arg7[%c0_14, %c0_15] : memref<1x8xf32, #tpu.memory_space<vmem>>, vector<1x8xf32>
    tpu.vector_store %arg7[%c0_14, %c0_15], %45 {strides = array<i32>} : memref<1x8xf32, #tpu.memory_space<vmem>>, vector<1x8xf32>,
    return
  }
  func.func @transform_0(%arg0: i32, %arg1: memref<1xi32, #tpu.memory_space<smem>>) -> (i32, i32) {
    %c0_i32 = arith.constant 0 : i32
    %c0_i32_0 = arith.constant 0 : i32
    return %arg0, %c0_i32 : i32, i32
  }
  func.func @transform_1(%arg0: i32, %arg1: memref<1xi32, #tpu.memory_space<smem>>) -> (i32, i32) {
    %c0_i32 = arith.constant 0 : i32
    %c0_i32_0 = arith.constant 0 : i32
    %c0_i32_1 = arith.constant 0 : i32
    return %c0_i32, %c0_i32_0 : i32, i32
  }
  func.func @transform_2(%arg0: i32, %arg1: memref<1xi32, #tpu.memory_space<smem>>) -> (i32, i32) {
    %c0_i32 = arith.constant 0 : i32
    %c0_i32_0 = arith.constant 0 : i32
    %c0_i32_1 = arith.constant 0 : i32
    return %c0_i32, %c0_i32_0 : i32, i32
  }
  func.func @transform_3(%arg0: i32, %arg1: memref<1xi32, #tpu.memory_space<smem>>) -> (i32, i32) {
    %c0_i32 = arith.constant 0 : i32
    %c0_i32_0 = arith.constant 0 : i32
    %c0_i32_1 = arith.constant 0 : i32
    return %c0_i32, %c0_i32_0 : i32, i32
  }
  func.func @transform_4(%arg0: i32, %arg1: memref<1xi32, #tpu.memory_space<smem>>) -> i32 {
    %c0_i32 = arith.constant 0 : i32
    %c0_i32_0 = arith.constant 0 : i32
    return %c0_i32 : i32
  }
  func.func @transform_5(%arg0: i32, %arg1: memref<1xi32, #tpu.memory_space<smem>>) -> (i32, i32) {
    %c0_i32 = arith.constant 0 : i32
    %c0_i32_0 = arith.constant 0 : i32
    return %arg0, %c0_i32 : i32, i32
  }
}

</mosaic_0001>

<bundles_post_ra>
// kernel: tpu_custom_call.1
= control target key start
LH: loop header
LB: loop body
LE: loop exit
PB: predicated region body
PF: predicated region fallthrough
CT: control target
= control target key end

     0   :  { %13 = vsyncpa [#allocation6], 0  ;;  %s463_s0 = inlined_call_operand.<no memory space> [shape: s32[1], index: 0, kind: input, shape index: {}]   ;;  %s464_s1 = inlined_call_operand.hbm [shape: f32[8,32], index: 1, kind: input, shape index: {}]   ;;  %s465_s2 = inlined_call_operand.hbm [shape: f32[32,128], index: 2, kind: input, shape index: {}]   ;;  %s466_s3 = inlined_call_operand.vmem [shape: f32[1,128], index: 3, kind: input, shape index: {}]   ;;  %s467_s4 = inlined_call_operand.vmem [shape: f32[1,128], index: 4, kind: input, shape index: {}]   ;;  %s468_s5 = inlined_call_operand.<no memory space> [shape: f32[1], index: 5, kind: input, shape index: {}]   ;;  %s469_s6 = inlined_call_operand.hbm [shape: f32[1,8], index: 6, kind: output, shape index: {}]  }
   0x1   :  { %14 = vsyncpa [#allocation9], 0 }
   0x2   :  { %15 = vsyncpa [#allocation7], 0  ;;  %s365_s21 = smov [#allocation5]   ;;  %s366_s23 = smov [#allocation8]  }
   0x3   :  { %s22_s22 = sshll.u32 %s365_s21, 4  ;;  %s31_s24 = sshll.u32 %s366_s23, 4  ;;  %s23_s22 = int_to_ptr.vmem [resolvable:$true] %s22_s22  ;;  %s408_s24 = int_to_ptr.vmem [resolvable:$true] %s31_s24 }
   0x4   :  { %s293_s27 = scalar_lea.hbm %s464_s1, 128 }
   0x5   :  { %p294_p0 = scmp.ne.s32.totalorder %s464_s1, %s293_s27  ;;  %p297_p1 = scmp.lt.u32.totalorder %s293_s27, %s464_s1 }
   0x7   :  { %p299_p2 = pnand %p297_p1, %p294_p0 }
   0x9   :  { %302 = shalt.err (!%p299_p2)
}
   0xa   :  { %s303_s8 = scalar_lea.vmem %s23_s22, 128  ;;  %p308_p4 = scmp.lt.s32.totalorder %s23_s22, %s23_s22 }
   0xb   :  { %p304_p3 = scmp.ne.s32.totalorder %s23_s22, %s303_s8  ;;  %p309_p5 = scmp.lt.s32.totalorder %s303_s8, %s303_s8 }
   0xd   :  { %p310_p6 = por %p309_p5, %p308_p4 }
   0xf   :  { %p311_p7 = pnand %p310_p6, %p304_p3 }
  0x11   :  { %314 = shalt.err (!%p311_p7)
}
  0x12   :  { %25 = dma.hbm_to_vmem [thread:$0]  %s464_s1, 128, %s23_s22, [#allocation6]  }
  0x13   :  { %s315_s13 = scalar_lea.hbm %s465_s2, 512 }
  0x14   :  { %p316_p8 = scmp.ne.s32.totalorder %s465_s2, %s315_s13  ;;  %p319_p9 = scmp.lt.u32.totalorder %s315_s13, %s465_s2 }
  0x16   :  { %p321_p10 = pnand %p319_p9, %p316_p8 }
  0x18   :  { %324 = shalt.err (!%p321_p10)
}
  0x19   :  { %s325_s18 = scalar_lea.vmem %s408_s24, 512  ;;  %p330_p12 = scmp.lt.s32.totalorder %s408_s24, %s408_s24 }
  0x1a   :  { %p326_p11 = scmp.ne.s32.totalorder %s408_s24, %s325_s18  ;;  %p331_p13 = scmp.lt.s32.totalorder %s325_s18, %s325_s18 }
  0x1c   :  { %p332_p0 = por %p331_p13, %p330_p12 }
  0x1e   :  { %p333_p1 = pnand %p332_p0, %p326_p11 }
  0x20   :  { %336 = shalt.err (!%p333_p1)
}
  0x21   :  { %s367_s1 = smov 128   ;;  %s368_s19 = smov 8  }
  0x22   :  { %37 = dma.hbm_to_vmem [thread:$0]  %s465_s2, 512, %s408_s24, [#allocation9], %s367_s1, %s367_s1, %s368_s19  }
  0x23   :  { %359 = dma.done.wait [#allocation6], 128  }
  0x24   :  { %360 = vsyncadd [#allocation6], 4294967168 }
  0x25   :  { %361 = dma.done.wait [#allocation9], 512  }
  0x26   :  { %362 = vsyncadd [#allocation9], 4294966784  ;;  %v369_v0 = vmov 0.0|0.0   ;;  %vm370_vm0 = vmmov 0   ;;  %v371_v1 = vmov 0.0   ;;  %v51_v2 = vld [vmem:[#allocation8] sm:$0xff]  ;;  %v138_v9 = vlaneseq }
  0x27   :  { %279 = vmatprep.subr.bf16.mxu0 %v369_v0  ;;  %271 = vmatprep.mubr.msk.f32.mxu0 %vm370_vm0, %v371_v1  ;;  %v52_v3 = vld [vmem:[#allocation8 + $0x8] sm:$0xff]  ;;  %v53_v4 = vld [vmem:[#allocation8 + $0x10] sm:$0xff]  ;;  %v54_v6 = vld [vmem:[#allocation8 + $0x18] sm:$0xff]  ;;  %vm62_vm1 = vcmask 261120   ;;  %s147_s23 = smul.u32 2654435769, %s463_s0  ;;  %v164_v32 = vstv %s468_s5 }
  0x28   :  { %274 = vmatprep.subr.mxu1 %v371_v1  ;;  %276 = vmatprep.mubr.msk.f32.mxu1 %vm370_vm0, %v371_v1  ;;  %v280_v5 = vpack.c.bf16 %v52_v3, %v51_v2  ;;  %v283_v7 = vpack.c.bf16 %v54_v6, %v53_v4  ;;  %v50_v8 = vld [vmem:[#allocation5] sm:$0xff]  ;;  %v139_v10 = vshrl.u32 %v138_v9, 7  ;;  %v143_v11 = vand.u32 127, %v138_v9  ;;  %s372_s29 = smov [#allocation10]  }
  0x29   :  { %v148_v14 = vstv %s147_s23  ;;  %v253_v24 = vld [vmem:[%s466_s3] ss:$0 sm:$0xff]  ;;  %s243_s30 = sshll.u32 %s372_s29, 4  ;;  %vm235_vm3 = vcmask 57344   ;;  %s244_s30 = int_to_ptr.vmem [resolvable:$true] %s243_s30 }
  0x2a   :  { %281 = vmatpush3.bf16.msra.mxu0 %v280_v5  ;;  %v145_v12 = vmul.u32 128, %v139_v10  ;;  %v162_v31 = vld [vmem:[%s467_s4] sm:$0x1]  ;;  %s337_s3 = scalar_lea.vmem %s244_s30, 16  ;;  %s341_s7 = scalar_lea.vmem %s244_s30, 32 }
  0x2b   :  { %282 = vmatprep.subr.bf16.mxu0 %v369_v0  ;;  %p338_p2 = scmp.ne.s32.totalorder %s244_s30, %s337_s3  ;;  %p342_p3 = scmp.lt.s32.totalorder %s244_s30, %s244_s30 }
  0x2c   :  { %v146_v13 = vadd.s32 %v145_v12, %v143_v11  ;;  %p343_p4 = scmp.lt.s32.totalorder %s341_s7, %s337_s3 }
  0x2e   :  { %284 = vmatpush3.bf16.msra.mxu0 %v283_v7  ;;  %v149_v15 = vadd.s32 %v148_v14, %v146_v13  ;;  %p344_p5 = por %p343_p4, %p342_p3 }
  0x30   :  { %v150_v16 = vshrl.u32 %v149_v15, 16  ;;  %p345_p6 = pnand %p344_p5, %p338_p2 }
  0x31   :  { %272 = vmatmul.mubr.msk.f32.vlgmr.msra.gmra.mrb[0].mxu0 %vm62_vm1, %v50_v8 }
  0x32   :  { %v151_v17 = vxor.u32 %v150_v16, %v149_v15 }
  0x34   :  { %v152_v18 = vmul.u32 2146121005, %v151_v17 }
  0x36   :  { %v153_v19 = vshrl.u32 %v152_v18, 15 }
  0x38   :  { %v154_v20 = vxor.u32 %v153_v19, %v152_v18 }
  0x3a   :  { %v155_v21 = vmul.u32 2221713035, %v154_v20 }
  0x3c   :  { %v156_v22 = vshrl.u32 %v155_v21, 16 }
  0x3e   :  { %v157_v23 = vxor.u32 %v156_v22, %v155_v21 }
  0x40   :  { %v158_v26 = vand.u32 1, %v157_v23 }
  0x42   :  { %vm159_vm2 = vcmp.eq.s32.totalorder %v158_v26, 0 }
 0x104   :  { %v132_v25 = vpop.f32.mrb[0].mxu0 }
 0x105   :  { %v133_v27 = vadd.f32 %v253_v24, %v132_v25  ;;  %v273_v28 = vpop.f32.mrb[1].mxu0 }
 0x107   :  { %v136_v29 = vmax.f32 %v133_v27, 0.0 }
 0x109   :  { %v160_v30 = vmul.f32 2.0, %v136_v29 }
 0x10b   :  { %275 = vmatpush3.xpose.msk.msra.mxu1 %vm159_vm2, %v160_v30 }
 0x10e   :  { %277 = vmatmul.mubr.f32.vlgmr.msra.gmra.mrb[0].mxu1 %v162_v31 }
 0x1e1   :  { %v231_v33 = vpop.f32.mrb[0].mxu1 }
 0x1e2   :  { %v232_v34 = vadd.f32 %v231_v33, %v164_v32  ;;  %v278_v35 = vpop.f32.mrb[1].mxu1 }
 0x1e4   :  { %236 = vst.msk [vmem:[#allocation10] sm:$0x1] %vm235_vm3, %v232_v34 }
 0x1e5   :  { %348 = shalt.err (!%p345_p6)
}
 0x1e6   :  { %s349_s5 = scalar_lea.hbm %s469_s6, 16 }
 0x1e7   :  { %p350_p7 = scmp.ne.s32.totalorder %s469_s6, %s349_s5  ;;  %p353_p8 = scmp.lt.u32.totalorder %s349_s5, %s469_s6 }
 0x1e9   :  { %p355_p9 = pnand %p353_p8, %p350_p7 }
 0x1eb   :  { %358 = shalt.err (!%p355_p9)
}
 0x1ec   :  { %246 = dma.vmem_to_hbm [thread:$0]  %s244_s30, 16, %s469_s6, [#allocation7]  }
 0x1ed   :  { %363 = dma.done.wait [#allocation7], 16  }
 0x1ee   :  { %364 = vsyncadd [#allocation7], 4294967280 }
 0x1ef   :  { %250 = vsyncpa [#allocation6], 1 }
 0x1f0   :  { %251 = vsyncpa [#allocation9], 1 }
 0x1f1   :  { %252 = vsyncpa [#allocation7], 1 }

</bundles_post_ra>
